<compile_context>
chip_gen: v7x
topology: tpu7x:2x2x1
jax: 0.10.0
libtpu: 0.0.40
codegen_flags: <defaults>
</compile_context>

<pallas_src>
import jax
import jax.numpy as jnp
from jax import lax
from jax.experimental import pallas as pl
from jax.experimental.pallas import tpu as pltpu

# ---- Pooling hyper-parameters (module defaults, type_='directional') ----
CELL_SIDE = 2.0
N_PARAM = 4                        # module's `n` (coarse cells per side)
POOL_SIZE = 8
BLUR_SIZE = 0                      # default blur_size=0 -> no avg_pool2d blur
HIDDEN_DIM = 128
POOLING_DIM = 2                    # 'directional'
N_FINE = N_PARAM * POOL_SIZE       # 32  fine grid resolution
N_COARSE = N_PARAM * N_PARAM       # 16  coarse cells
OUT_DIM = N_COARSE * POOLING_DIM   # 32  flattened grid size
SUBLANE, LANE = 8, 128             # lane-dense padded output tile

_SCALE = POOL_SIZE / CELL_SIDE         # == 1 / (cell_side / pool_size) = 4.0 (exact)
_HALF = (N_PARAM * POOL_SIZE) / 2.0    # 16.0


def _directional_kernel(obs_ref, obs2t_ref, out_ref):
    """One scene per grid step.

    obs_ref   : (1, A, 4) = [obs1_x, obs1_y, obs2_x, obs2_y], agents on sublanes
    obs2t_ref : (1, 2, A) = obs2 transposed, agents on lanes (avoids relayouts)
    out_ref   : (1, 8, 128) lane-dense padded output; (2, 16) result in corner
    """
    A = obs_ref.shape[1]
    obs = obs_ref[0]                           # (A, 4)
    obs1 = obs[:, 0:2]
    obs2 = obs[:, 2:4]

    # --- agents-on-sublanes quantities --------------------------------------
    xy = obs2[0:1, :]                          # self (agent 0) position
    oij = (obs2 - xy) * _SCALE + _HALF         # (A, 2) fine grid coordinates
    vel = obs2 - obs1
    vals = vel - vel[0:1, :]                   # (A, 2) directional other_values

    k_idx = lax.broadcasted_iota(jnp.int32, (A, 1), 0)
    in_range = ((oij[:, 0:1] >= 0.0) & (oij[:, 0:1] < float(N_FINE))
                & (oij[:, 1:2] >= 0.0) & (oij[:, 1:2] < float(N_FINE)))
    valid = ((k_idx != 0)                                  # one_cold: drop self row
             & jnp.logical_not(jnp.isnan(obs2[:, 0:1]))    # isnan(other_xy[:,0]) filter
             & jnp.logical_not(jnp.isnan(obs2[0:1, 0:1]))  # xy[0] != xy[0] early-out
             & in_range)                                   # range_violations == 0

    fi = jnp.floor(oij)                        # == .long() for in-range (>=0) coords
    oi = fi[:, 0:1] * float(N_FINE) + fi[:, 1:2]            # (A, 1) fine cell id (exact in f32)
    ci = (jnp.floor(oij[:, 0:1] / POOL_SIZE) * N_PARAM
          + jnp.floor(oij[:, 1:2] / POOL_SIZE))             # (A, 1) coarse cell id

    # --- agents-on-lanes copies (from transposed input, no in-kernel transpose) --
    obs2t = obs2t_ref[0]                       # (2, A): row0 = x, row1 = y
    oij_t = (obs2t - obs2t[:, 0:1]) * _SCALE + _HALF        # (2, A)
    j_idx = lax.broadcasted_iota(jnp.int32, (1, A), 1)
    in_range_r = ((oij_t[0:1, :] >= 0.0) & (oij_t[0:1, :] < float(N_FINE))
                  & (oij_t[1:2, :] >= 0.0) & (oij_t[1:2, :] < float(N_FINE)))
    valid_r = ((j_idx != 0)
               & jnp.logical_not(jnp.isnan(obs2t[0:1, :]))
               & jnp.logical_not(jnp.isnan(obs2t[0:1, 0:1]))
               & in_range_r)                                # (1, A)
    oi_r = (jnp.floor(oij_t[0:1, :]) * float(N_FINE)
            + jnp.floor(oij_t[1:2, :]))                     # (1, A)

    # --- last-writer-wins among VALID agents sharing a fine cell (VPU/XLU only) --
    r = lax.broadcasted_iota(jnp.int32, (A, A), 0)
    c = lax.broadcasted_iota(jnp.int32, (A, A), 1)
    later_same = (c > r) & valid_r & (oi == oi_r)           # (A, A)
    overwritten = jnp.sum(jnp.where(later_same, 1.0, 0.0),
                          axis=1, keepdims=True) > 0.0      # (A, 1)
    keep = valid & jnp.logical_not(overwritten)             # single folded mask

    # --- scatter + 8x8 block-sum pool fused into a lane-dense (A, 128) one-hot ---
    lane = lax.broadcasted_iota(jnp.int32, (A, LANE), 1).astype(jnp.float32)
    b = jnp.where(keep & (ci == lane), 1.0, 0.0)            # lanes >= 16 never match
    vals = jnp.where(keep, vals, 0.0)                       # NaN guard for masked rows

    # Final (2, 16) projection on the VPU: broadcast-multiply, reduce over sublanes.
    out0 = jnp.sum(vals[:, 0:1] * b, axis=0, keepdims=True)  # (1, 128) channel 0
    out1 = jnp.sum(vals[:, 1:2] * b, axis=0, keepdims=True)  # (1, 128) channel 1
    row = lax.broadcasted_iota(jnp.int32, (SUBLANE, LANE), 0)
    out_ref[0] = jnp.where(row == 0, out0, 0.0) + jnp.where(row == 1, out1, 0.0)


@jax.jit
def pooling_directional_batched(obs1, obs2):
    """Batched Pooling.directional: obs1, obs2 are (B, A, 2) -> (B, 1, n*n*2)."""
    B, A, _ = obs2.shape
    if A == 1:
        # torch: occupancy(obs2[0], None).unsqueeze(0) == zeros
        return jnp.zeros((B, 1, OUT_DIM), jnp.float32)

    obs = jnp.concatenate([obs1, obs2], axis=-1).astype(jnp.float32)     # (B, A, 4)
    obs2_t = jnp.swapaxes(obs2.astype(jnp.float32), -1, -2)              # (B, 2, A)

    padded = pl.pallas_call(
        _directional_kernel,
        out_shape=jax.ShapeDtypeStruct((B, SUBLANE, LANE), jnp.float32),
        grid=(B,),
        in_specs=[
            pl.BlockSpec((1, A, 4), lambda b: (b, 0, 0)),
            pl.BlockSpec((1, 2, A), lambda b: (b, 0, 0)),
        ],
        out_specs=pl.BlockSpec((1, SUBLANE, LANE), lambda b: (b, 0, 0)),
        compiler_params=pltpu.CompilerParams(dimension_semantics=("parallel",)),
    )(obs, obs2_t)

    # (2, 16) row-major flatten per scene == torch (1, D, 4, 4).view(-1);
    # torch.stack over range(1) adds the leading singleton.
    return padded[:, :POOLING_DIM, :N_COARSE].reshape(B, OUT_DIM)[:, None, :]


def pooling_forward(hidden_state, obs1, obs2):
    """Pooling.forward for type_='directional' on a single scene (A, 2) tensors."""
    del hidden_state  # unused by the 'directional' path
    # TODO(synk): self.embedding (Linear(n*n*2, out_dim) + ReLU) is constructed in
    # __init__ but never applied in the source forward(), so it is omitted here.
    return pooling_directional_batched(obs1[None], obs2[None])[0]


if __name__ == "__main__":
    key = jax.random.PRNGKey(0)
    k1, k2 = jax.random.split(key, 2)

    B, A = 4, 8
    obs1 = jax.random.uniform(k1, (B, A, 2), minval=-3.0, maxval=3.0)
    obs2 = obs1 + 0.1 * jax.random.normal(k2, (B, A, 2))

    grids = jax.block_until_ready(pooling_directional_batched(obs1, obs2))
    assert grids.shape == (B, 1, OUT_DIM)

    hidden_state = jnp.zeros((A, HIDDEN_DIM), jnp.float32)
    g0 = jax.block_until_ready(pooling_forward(hidden_state, obs1[0], obs2[0]))
    assert g0.shape == (1, OUT_DIM)
    assert jnp.allclose(g0, grids[0])   # single-scene path consistent with batched path

    print("KERNEL_OK")
</pallas_src>

<mosaic_0001>
module attributes {stable_mosaic.version = 11 : i64} {
  func.func @_directional_kernel(%arg0: i32, %arg1: memref<1x8x4xf32, #tpu.memory_space<vmem>>, %arg2: memref<1x2x8xf32, #tpu.memory_space<vmem>>, %arg3: memref<1x8x128xf32, #tpu.memory_space<vmem>>) attributes {dimension_semantics = [#tpu.dimension_semantics<parallel>], iteration_bounds = array<i64: 4>, scalar_prefetch = 0 : i64, scratch_operands = 0 : i64, tpu.core_type = #tpu.core_type<tc>, window_params = [{transform_indices = @transform_0, window_bounds = array<i64: 1, 8, 4>}, {transform_indices = @transform_1, window_bounds = array<i64: 1, 2, 8>}, {transform_indices = @transform_2, window_bounds = array<i64: 1, 8, 128>}]} {
    %c0 = arith.constant 0 : index
    %c0_0 = arith.constant 0 : index
    %c0_1 = arith.constant 0 : index
    %0 = vector.load %arg1[%c0, %c0_0, %c0_1] : memref<1x8x4xf32, #tpu.memory_space<vmem>>, vector<1x8x4xf32>
    %1 = vector.shape_cast %0 : vector<1x8x4xf32> to vector<8x4xf32>
    %2 = vector.extract_strided_slice %1 {offsets = [0, 0], sizes = [8, 2], strides = [1, 1]} : vector<8x4xf32> to vector<8x2xf32>
    %3 = vector.extract_strided_slice %1 {offsets = [0, 2], sizes = [8, 2], strides = [1, 1]} : vector<8x4xf32> to vector<8x2xf32>
    %4 = vector.extract_strided_slice %3 {offsets = [0, 0], sizes = [1, 2], strides = [1, 1]} : vector<8x2xf32> to vector<1x2xf32>
    %5 = vector.broadcast %4 : vector<1x2xf32> to vector<8x2xf32>
    %6 = arith.subf %3, %5 : vector<8x2xf32>
    %cst = arith.constant 4.000000e+00 : f32
    %7 = vector.broadcast %cst : f32 to vector<8x2xf32>
    %8 = arith.mulf %6, %7 : vector<8x2xf32>
    %cst_2 = arith.constant 1.600000e+01 : f32
    %9 = vector.broadcast %cst_2 : f32 to vector<8x2xf32>
    %10 = arith.addf %8, %9 : vector<8x2xf32>
    %11 = arith.subf %3, %2 : vector<8x2xf32>
    %12 = vector.extract_strided_slice %11 {offsets = [0, 0], sizes = [1, 2], strides = [1, 1]} : vector<8x2xf32> to vector<1x2xf32>
    %13 = vector.broadcast %12 : vector<1x2xf32> to vector<8x2xf32>
    %14 = arith.subf %11, %13 : vector<8x2xf32>
    %15 = tpu.iota {dimensions = array<i32: 0>} : vector<8x1xi32>
    %16 = vector.extract_strided_slice %10 {offsets = [0, 0], sizes = [8, 1], strides = [1, 1]} : vector<8x2xf32> to vector<8x1xf32>
    %cst_3 = arith.constant 0.000000e+00 : f32
    %17 = vector.broadcast %cst_3 : f32 to vector<8x1xf32>
    %18 = arith.cmpf oge, %16, %17 : vector<8x1xf32>
    %19 = vector.extract_strided_slice %10 {offsets = [0, 0], sizes = [8, 1], strides = [1, 1]} : vector<8x2xf32> to vector<8x1xf32>
    %cst_4 = arith.constant 3.200000e+01 : f32
    %20 = vector.broadcast %cst_4 : f32 to vector<8x1xf32>
    %21 = arith.cmpf olt, %19, %20 : vector<8x1xf32>
    %22 = arith.andi %18, %21 : vector<8x1xi1>
    %23 = vector.extract_strided_slice %10 {offsets = [0, 1], sizes = [8, 1], strides = [1, 1]} : vector<8x2xf32> to vector<8x1xf32>
    %cst_5 = arith.constant 0.000000e+00 : f32
    %24 = vector.broadcast %cst_5 : f32 to vector<8x1xf32>
    %25 = arith.cmpf oge, %23, %24 : vector<8x1xf32>
    %26 = arith.andi %22, %25 : vector<8x1xi1>
    %27 = vector.extract_strided_slice %10 {offsets = [0, 1], sizes = [8, 1], strides = [1, 1]} : vector<8x2xf32> to vector<8x1xf32>
    %cst_6 = arith.constant 3.200000e+01 : f32
    %28 = vector.broadcast %cst_6 : f32 to vector<8x1xf32>
    %29 = arith.cmpf olt, %27, %28 : vector<8x1xf32>
    %30 = arith.andi %26, %29 : vector<8x1xi1>
    %c0_i32 = arith.constant 0 : i32
    %31 = vector.broadcast %c0_i32 : i32 to vector<8x1xi32>
    %32 = arith.cmpi ne, %15, %31 : vector<8x1xi32>
    %33 = vector.extract_strided_slice %3 {offsets = [0, 0], sizes = [8, 1], strides = [1, 1]} : vector<8x2xf32> to vector<8x1xf32>
    %34 = arith.cmpf one, %33, %33 : vector<8x1xf32>
    %cst_7 = arith.constant dense<true> : vector<8x1xi1>
    %35 = arith.xori %34, %cst_7 : vector<8x1xi1>
    %36 = arith.andi %32, %35 : vector<8x1xi1>
    %37 = vector.extract_strided_slice %3 {offsets = [0, 0], sizes = [1, 1], strides = [1, 1]} : vector<8x2xf32> to vector<1x1xf32>
    %38 = arith.cmpf one, %37, %37 : vector<1x1xf32>
    %cst_8 = arith.constant dense<true> : vector<1x1xi1>
    %39 = arith.xori %38, %cst_8 : vector<1x1xi1>
    %40 = vector.broadcast %39 : vector<1x1xi1> to vector<8x1xi1>
    %41 = arith.andi %36, %40 : vector<8x1xi1>
    %42 = arith.andi %41, %30 : vector<8x1xi1>
    %43 = math.floor %10 : vector<8x2xf32>
    %44 = vector.extract_strided_slice %43 {offsets = [0, 0], sizes = [8, 1], strides = [1, 1]} : vector<8x2xf32> to vector<8x1xf32>
    %cst_9 = arith.constant 3.200000e+01 : f32
    %45 = vector.broadcast %cst_9 : f32 to vector<8x1xf32>
    %46 = arith.mulf %44, %45 : vector<8x1xf32>
    %47 = vector.extract_strided_slice %43 {offsets = [0, 1], sizes = [8, 1], strides = [1, 1]} : vector<8x2xf32> to vector<8x1xf32>
    %48 = arith.addf %46, %47 : vector<8x1xf32>
    %49 = vector.extract_strided_slice %10 {offsets = [0, 0], sizes = [8, 1], strides = [1, 1]} : vector<8x2xf32> to vector<8x1xf32>
    %cst_10 = arith.constant 8.000000e+00 : f32
    %50 = vector.broadcast %cst_10 : f32 to vector<8x1xf32>
    %51 = arith.divf %49, %50 : vector<8x1xf32>
    %52 = math.floor %51 : vector<8x1xf32>
    %cst_11 = arith.constant 4.000000e+00 : f32
    %53 = vector.broadcast %cst_11 : f32 to vector<8x1xf32>
    %54 = arith.mulf %52, %53 : vector<8x1xf32>
    %55 = vector.extract_strided_slice %10 {offsets = [0, 1], sizes = [8, 1], strides = [1, 1]} : vector<8x2xf32> to vector<8x1xf32>
    %cst_12 = arith.constant 8.000000e+00 : f32
    %56 = vector.broadcast %cst_12 : f32 to vector<8x1xf32>
    %57 = arith.divf %55, %56 : vector<8x1xf32>
    %58 = math.floor %57 : vector<8x1xf32>
    %59 = arith.addf %54, %58 : vector<8x1xf32>
    %c0_13 = arith.constant 0 : index
    %c0_14 = arith.constant 0 : index
    %c0_15 = arith.constant 0 : index
    %60 = vector.load %arg2[%c0_13, %c0_14, %c0_15] : memref<1x2x8xf32, #tpu.memory_space<vmem>>, vector<1x2x8xf32>
    %61 = vector.shape_cast %60 : vector<1x2x8xf32> to vector<2x8xf32>
    %62 = vector.extract_strided_slice %61 {offsets = [0, 0], sizes = [2, 1], strides = [1, 1]} : vector<2x8xf32> to vector<2x1xf32>
    %63 = vector.broadcast %62 : vector<2x1xf32> to vector<2x8xf32>
    %64 = arith.subf %61, %63 : vector<2x8xf32>
    %cst_16 = arith.constant 4.000000e+00 : f32
    %65 = vector.broadcast %cst_16 : f32 to vector<2x8xf32>
    %66 = arith.mulf %64, %65 : vector<2x8xf32>
    %cst_17 = arith.constant 1.600000e+01 : f32
    %67 = vector.broadcast %cst_17 : f32 to vector<2x8xf32>
    %68 = arith.addf %66, %67 : vector<2x8xf32>
    %69 = tpu.iota {dimensions = array<i32: 1>} : vector<1x8xi32>
    %70 = vector.extract_strided_slice %68 {offsets = [0, 0], sizes = [1, 8], strides = [1, 1]} : vector<2x8xf32> to vector<1x8xf32>
    %cst_18 = arith.constant 0.000000e+00 : f32
    %71 = vector.broadcast %cst_18 : f32 to vector<1x8xf32>
    %72 = arith.cmpf oge, %70, %71 : vector<1x8xf32>
    %73 = vector.extract_strided_slice %68 {offsets = [0, 0], sizes = [1, 8], strides = [1, 1]} : vector<2x8xf32> to vector<1x8xf32>
    %cst_19 = arith.constant 3.200000e+01 : f32
    %74 = vector.broadcast %cst_19 : f32 to vector<1x8xf32>
    %75 = arith.cmpf olt, %73, %74 : vector<1x8xf32>
    %76 = arith.andi %72, %75 : vector<1x8xi1>
    %77 = vector.extract_strided_slice %68 {offsets = [1, 0], sizes = [1, 8], strides = [1, 1]} : vector<2x8xf32> to vector<1x8xf32>
    %cst_20 = arith.constant 0.000000e+00 : f32
    %78 = vector.broadcast %cst_20 : f32 to vector<1x8xf32>
    %79 = arith.cmpf oge, %77, %78 : vector<1x8xf32>
    %80 = arith.andi %76, %79 : vector<1x8xi1>
    %81 = vector.extract_strided_slice %68 {offsets = [1, 0], sizes = [1, 8], strides = [1, 1]} : vector<2x8xf32> to vector<1x8xf32>
    %cst_21 = arith.constant 3.200000e+01 : f32
    %82 = vector.broadcast %cst_21 : f32 to vector<1x8xf32>
    %83 = arith.cmpf olt, %81, %82 : vector<1x8xf32>
    %84 = arith.andi %80, %83 : vector<1x8xi1>
    %c0_i32_22 = arith.constant 0 : i32
    %85 = vector.broadcast %c0_i32_22 : i32 to vector<1x8xi32>
    %86 = arith.cmpi ne, %69, %85 : vector<1x8xi32>
    %87 = vector.extract_strided_slice %61 {offsets = [0, 0], sizes = [1, 8], strides = [1, 1]} : vector<2x8xf32> to vector<1x8xf32>
    %88 = arith.cmpf one, %87, %87 : vector<1x8xf32>
    %cst_23 = arith.constant dense<true> : vector<1x8xi1>
    %89 = arith.xori %88, %cst_23 : vector<1x8xi1>
    %90 = arith.andi %86, %89 : vector<1x8xi1>
    %91 = vector.extract_strided_slice %61 {offsets = [0, 0], sizes = [1, 1], strides = [1, 1]} : vector<2x8xf32> to vector<1x1xf32>
    %92 = arith.cmpf one, %91, %91 : vector<1x1xf32>
    %cst_24 = arith.constant dense<true> : vector<1x1xi1>
    %93 = arith.xori %92, %cst_24 : vector<1x1xi1>
    %94 = vector.broadcast %93 : vector<1x1xi1> to vector<1x8xi1>
    %95 = arith.andi %90, %94 : vector<1x8xi1>
    %96 = arith.andi %95, %84 : vector<1x8xi1>
    %97 = vector.extract_strided_slice %68 {offsets = [0, 0], sizes = [1, 8], strides = [1, 1]} : vector<2x8xf32> to vector<1x8xf32>
    %98 = math.floor %97 : vector<1x8xf32>
    %cst_25 = arith.constant 3.200000e+01 : f32
    %99 = vector.broadcast %cst_25 : f32 to vector<1x8xf32>
    %100 = arith.mulf %98, %99 : vector<1x8xf32>
    %101 = vector.extract_strided_slice %68 {offsets = [1, 0], sizes = [1, 8], strides = [1, 1]} : vector<2x8xf32> to vector<1x8xf32>
    %102 = math.floor %101 : vector<1x8xf32>
    %103 = arith.addf %100, %102 : vector<1x8xf32>
    %104 = tpu.iota {dimensions = array<i32: 0>} : vector<8x8xi32>
    %105 = tpu.iota {dimensions = array<i32: 1>} : vector<8x8xi32>
    %106 = arith.cmpi sgt, %105, %104 : vector<8x8xi32>
    %107 = vector.broadcast %96 : vector<1x8xi1> to vector<8x8xi1>
    %108 = arith.andi %106, %107 : vector<8x8xi1>
    %109 = vector.broadcast %48 : vector<8x1xf32> to vector<8x8xf32>
    %110 = vector.broadcast %103 : vector<1x8xf32> to vector<8x8xf32>
    %111 = arith.cmpf oeq, %109, %110 : vector<8x8xf32>
    %112 = arith.andi %108, %111 : vector<8x8xi1>
    %cst_26 = arith.constant 1.000000e+00 : f32
    %cst_27 = arith.constant 0.000000e+00 : f32
    %113 = vector.broadcast %cst_26 : f32 to vector<8x8xf32>
    %114 = vector.broadcast %cst_27 : f32 to vector<8x8xf32>
    %115 = arith.select %112, %113, %114 : vector<8x8xi1>, vector<8x8xf32>
    %cst_28 = arith.constant dense<0.000000e+00> : vector<8xf32>
    %116 = vector.multi_reduction <add>, %115, %cst_28 [1] : vector<8x8xf32> to vector<8xf32>
    %117 = vector.shape_cast %116 : vector<8xf32> to vector<8x1xf32>
    %cst_29 = arith.constant 0.000000e+00 : f32
    %118 = vector.broadcast %cst_29 : f32 to vector<8x1xf32>
    %119 = arith.cmpf ogt, %117, %118 : vector<8x1xf32>
    %cst_30 = arith.constant dense<true> : vector<8x1xi1>
    %120 = arith.xori %119, %cst_30 : vector<8x1xi1>
    %121 = arith.andi %42, %120 : vector<8x1xi1>
    %122 = tpu.iota {dimensions = array<i32: 1>} : vector<8x128xi32>
    %123 = arith.sitofp %122 : vector<8x128xi32> to vector<8x128xf32>
    %124 = vector.broadcast %59 : vector<8x1xf32> to vector<8x128xf32>
    %125 = arith.cmpf oeq, %124, %123 : vector<8x128xf32>
    %126 = vector.broadcast %121 : vector<8x1xi1> to vector<8x128xi1>
    %127 = arith.andi %126, %125 : vector<8x128xi1>
    %cst_31 = arith.constant 1.000000e+00 : f32
    %cst_32 = arith.constant 0.000000e+00 : f32
    %128 = vector.broadcast %cst_31 : f32 to vector<8x128xf32>
    %129 = vector.broadcast %cst_32 : f32 to vector<8x128xf32>
    %130 = arith.select %127, %128, %129 : vector<8x128xi1>, vector<8x128xf32>
    %cst_33 = arith.constant 0.000000e+00 : f32
    %131 = vector.shape_cast %121 : vector<8x1xi1> to vector<8x1xi1>
    %132 = vector.broadcast %131 : vector<8x1xi1> to vector<8x2xi1>
    %133 = vector.broadcast %cst_33 : f32 to vector<8x2xf32>
    %134 = arith.select %132, %14, %133 : vector<8x2xi1>, vector<8x2xf32>
    %135 = vector.extract_strided_slice %134 {offsets = [0, 0], sizes = [8, 1], strides = [1, 1]} : vector<8x2xf32> to vector<8x1xf32>
    %136 = vector.broadcast %135 : vector<8x1xf32> to vector<8x128xf32>
    %137 = arith.mulf %136, %130 : vector<8x128xf32>
    %cst_34 = arith.constant dense<0.000000e+00> : vector<128xf32>
    %138 = vector.multi_reduction <add>, %137, %cst_34 [0] : vector<8x128xf32> to vector<128xf32>
    %139 = vector.shape_cast %138 : vector<128xf32> to vector<1x128xf32>
    %140 = vector.extract_strided_slice %134 {offsets = [0, 1], sizes = [8, 1], strides = [1, 1]} : vector<8x2xf32> to vector<8x1xf32>
    %141 = vector.broadcast %140 : vector<8x1xf32> to vector<8x128xf32>
    %142 = arith.mulf %141, %130 : vector<8x128xf32>
    %cst_35 = arith.constant dense<0.000000e+00> : vector<128xf32>
    %143 = vector.multi_reduction <add>, %142, %cst_35 [0] : vector<8x128xf32> to vector<128xf32>
    %144 = vector.shape_cast %143 : vector<128xf32> to vector<1x128xf32>
    %145 = tpu.iota {dimensions = array<i32: 0>} : vector<8x128xi32>
    %c0_i32_36 = arith.constant 0 : i32
    %146 = vector.broadcast %c0_i32_36 : i32 to vector<8x128xi32>
    %147 = arith.cmpi eq, %145, %146 : vector<8x128xi32>
    %cst_37 = arith.constant 0.000000e+00 : f32
    %148 = vector.shape_cast %139 : vector<1x128xf32> to vector<1x128xf32>
    %149 = vector.broadcast %148 : vector<1x128xf32> to vector<8x128xf32>
    %150 = vector.broadcast %cst_37 : f32 to vector<8x128xf32>
    %151 = arith.select %147, %149, %150 : vector<8x128xi1>, vector<8x128xf32>
    %c1_i32 = arith.constant 1 : i32
    %152 = vector.broadcast %c1_i32 : i32 to vector<8x128xi32>
    %153 = arith.cmpi eq, %145, %152 : vector<8x128xi32>
    %cst_38 = arith.constant 0.000000e+00 : f32
    %154 = vector.shape_cast %144 : vector<1x128xf32> to vector<1x128xf32>
    %155 = vector.broadcast %154 : vector<1x128xf32> to vector<8x128xf32>
    %156 = vector.broadcast %cst_38 : f32 to vector<8x128xf32>
    %157 = arith.select %153, %155, %156 : vector<8x128xi1>, vector<8x128xf32>
    %158 = arith.addf %151, %157 : vector<8x128xf32>
    %c0_39 = arith.constant 0 : index
    %c0_40 = arith.constant 0 : index
    %c0_41 = arith.constant 0 : index
    %159 = vector.load %arg3[%c0_39, %c0_40, %c0_41] : memref<1x8x128xf32, #tpu.memory_space<vmem>>, vector<1x8x128xf32>
    %160 = vector.shape_cast %159 : vector<1x8x128xf32> to vector<8x128xf32>
    %161 = vector.shape_cast %158 : vector<8x128xf32> to vector<1x8x128xf32>
    tpu.vector_store %arg3[%c0_39, %c0_40, %c0_41], %161 {strides = array<i32>} : memref<1x8x128xf32, #tpu.memory_space<vmem>>, vector<1x8x128xf32>,
    return
  }
  func.func @transform_0(%arg0: i32) -> (i32, i32, i32) {
    %c0_i32 = arith.constant 0 : i32
    %c0_i32_0 = arith.constant 0 : i32
    %c0_i32_1 = arith.constant 0 : i32
    return %arg0, %c0_i32, %c0_i32_0 : i32, i32, i32
  }
  func.func @transform_1(%arg0: i32) -> (i32, i32, i32) {
    %c0_i32 = arith.constant 0 : i32
    %c0_i32_0 = arith.constant 0 : i32
    %c0_i32_1 = arith.constant 0 : i32
    return %arg0, %c0_i32, %c0_i32_0 : i32, i32, i32
  }
  func.func @transform_2(%arg0: i32) -> (i32, i32, i32) {
    %c0_i32 = arith.constant 0 : i32
    %c0_i32_0 = arith.constant 0 : i32
    %c0_i32_1 = arith.constant 0 : i32
    return %arg0, %c0_i32, %c0_i32_0 : i32, i32, i32
  }
}

</mosaic_0001>

<bundles_post_ra>
// kernel: pooling_directional_batched.1
= control target key start
LH: loop header
LB: loop body
LE: loop exit
PB: predicated region body
PF: predicated region fallthrough
CT: control target
= control target key end

     0   :  { %s452_s9 = smov 0   ;;  %s544_s0 = inlined_call_operand.vmem [shape: f32[4,8,4], index: 0, kind: input, shape index: {}]   ;;  %s545_s1 = inlined_call_operand.vmem [shape: f32[4,2,8], index: 1, kind: input, shape index: {}]   ;;  %s546_s2 = inlined_call_operand.vmem [shape: f32[4,8,128], index: 2, kind: output, shape index: {}]  }
   0x1 LB: > { %s392_s10 = sadd.s32 4294967295, %s428_s9   ;;  %p396_p0 = scmp.ge.s32.totalorder %s428_s9, 1  ;;  %s428_s9 = sphi %s452_s9, %s12_s9  }
   0x2   : > { %p120_p1 = scmp.lt.s32.totalorder %s428_s9, 5 }
   0x4   : > { %p121_p2 = pnand %p396_p0, %p120_p1 }
   0x5   : > { %p144_p3 = scmp.lt.s32.totalorder (!%p121_p2), %s392_s10, 3  ;;  %v157_v0 = vlaneseq (!%p121_p2)  ;;  %v430_v1 = vmov (!%p121_p2), 0   ;;  %vm431_vm1 = vmmov (!%p121_p2), 1   ;;  %v432_v12 = vmov (!%p121_p2), 2   ;;  %s433_s19 = smov (!%p121_p2), 127  }
   0x6   : > { %124 = sbr.rel (%p121_p2) target bundleno = 711 (0x2c7), region = 28  ;;  %417 = vset.pattern.permute.xlu0 (!%p121_p2), %v430_v1  ;;  %418 = vset.pattern.permute.xlu1 (!%p121_p2), %v430_v1  ;;  %s434_s20 = smov (!%p121_p2), 2   ;;  %v435_v38 = vmov (!%p121_p2), 0.0   ;;  %v436_v58 = vmov (!%p121_p2), 3  }
   0x7   : > { %v464_v2 = vshrl.u32 (!%p121_p2), %v157_v0, 7  ;;  %v508_v25 = vand.u32 (!%p121_p2), 127, %v157_v0 }
   0x9   : > { %v468_v3 = vsub.s32 (!%p121_p2), 0, %v464_v2  ;;  %vm239_vm8 = vcmp.ne.s32.totalorder (!%p121_p2), %v508_v25, 0  ;;  %v283_v59 = vcvt.s32.f32 (!%p121_p2), %v508_v25 }
   0xd   : > { %s552_s10 = smov (!%p144_p3, %s392_s10), 3 }
   0xe   : > { %s397_s11 = sshll.u32 %s552_s10, 3  ;;  %s398_s12 = sshll.u32 %s552_s10, 1 }
   0xf   : > { %s147_s15 = scalar_lea.vmem %s544_s0, %s397_s11  ;;  %s151_s18 = scalar_lea.vmem %s545_s1, %s398_s12 }
  0x10   : > { %v479_v4 = vld [vmem:[%s147_s15] sm:$0xff]  ;;  %s155_s23 = scalar_lea.vmem %s546_s2, %s397_s11 }
  0x11   : > { %v217_v5 = vld [vmem:[%s151_s18] sm:$0x3]  ;;  %v160_v6 = vrot.slane %v479_v4, %v468_v3 }
  0x12   : > { %vm240_vm0 = vcmp.ne.f32.partialorder %v217_v5, %v217_v5 }
  0x13   : > { %vm484_vm2 = vmxor %vm240_vm0, %vm431_vm1  ;;  %v161_v8 = vsub.f32 %v479_v4, %v160_v6 }
  0x14   : > { %v243_v9 = vsel %vm484_vm2, 1, %v430_v1  ;;  %vm242_vm11 = vmand %vm239_vm8, %vm484_vm2  ;;  %vm276_vm8 = vcmask 64512  }
  0x15   : > { %245 = vperm.xlu1 %418, %v243_v9   ;;  %v162_v10 = vmul.f32 4.0, %v161_v8 }
  0x17   : > { %v492_v11 = vadd.f32 16.0, %v162_v10 }
  0x19   : > { %419 = vset.pattern.permute.xlu1 %v432_v12  ;;  %v201_v13 = vfloor.f32 %v492_v11  ;;  %vm176_vm3 = vcmp.ge.f32.partialorder %v492_v11, 0.0  ;;  %vm177_vm4 = vcmp.lt.f32.partialorder %v492_v11, 32.0  ;;  %v209_v46 = vmul.f32 0.125, %v492_v11 }
  0x1a   : > { %v179_v17 = vsel %vm176_vm3, 1, %v430_v1  ;;  %vm500_vm5 = vmand %vm176_vm3, %vm177_vm4  ;;  %v184_v19 = vsel %vm177_vm4, 1, %v430_v1  ;;  %vm256_vm4 = vcmp.gt.s32.totalorder %v508_v25, %v464_v2 }
  0x1b   : > { %204 = vrot.lane.b32.xlu0 %v201_v13, %s433_s19  ;;  %v202_v14 = vmul.f32 32.0, %v201_v13  ;;  %v210_v48 = vfloor.f32 %v209_v46 }
  0x1d   : > { %v211_v52 = vmul.f32 4.0, %v210_v48 }
  0x1f   : > { %220 = vperm.xlu0 %417, %v217_v5  }
  0x23   : > { %420 = vset.pattern.permute.xlu0 %v432_v12 }
  0x24   : > { %180 = vrot.lane.b32.xlu0 %v179_v17, %s433_s19 }
  0x28   : > { %185 = vrot.lane.b32.xlu0 %v184_v19, %s433_s19 }
  0x2c   : > { %165 = vrot.lane.b32.xlu0 %v479_v4, %s434_s20 }
  0x8d   : > { %v205_v15 = vpop.permute.xlu0 %204 }
  0x8e   : > { %v207_v16 = vadd.f32 %v205_v15, %v202_v14 }
  0x90   : > { %266 = vperm.xlu1 %419, %v207_v16  }
  0x94   : > { %v246_v28 = vpop.permute.xlu1 %245 }
  0x95   : > { %vm247_vm12 = vcmp.eq.s32.totalorder %v246_v28, 1 }
  0x96   : > { %vm248_vm15 = vmand %vm242_vm11, %vm247_vm12  ;;  %vm189_vm12 = vcmp.ne.s32.totalorder %v464_v2, 0 }
  0x9e   : > { %v221_v20 = vpop.permute.xlu0 %220 }
  0x9f   : > { %v223_v21 = vsub.f32 %v217_v5, %v221_v20 }
  0xa1   : > { %v224_v22 = vmul.f32 4.0, %v223_v21 }
  0xa2   : > { %v181_v41 = vpop.permute.xlu0 %180 }
  0xa3   : > { %v225_v23 = vadd.f32 16.0, %v224_v22 }
  0xa5   : > { %vm228_vm6 = vcmp.ge.f32.partialorder %v225_v23, 0.0  ;;  %vm229_vm7 = vcmp.lt.f32.partialorder %v225_v23, 32.0  ;;  %v250_v30 = vfloor.f32 %v225_v23 }
  0xa6   : > { %v231_v24 = vsel %vm228_vm6, 1, %v430_v1  ;;  %v235_v27 = vsel %vm229_vm7, 1, %v430_v1  ;;  %vm230_vm9 = vmand %vm228_vm6, %vm229_vm7  ;;  %v186_v44 = vpop.permute.xlu0 %185 }
  0xa7   : > { %v232_v26 = vrot.slane %v231_v24, 1  ;;  %v236_v29 = vrot.slane %v235_v27, 1  ;;  %v251_v32 = vmul.f32 32.0, %v250_v30  ;;  %v253_v33 = vrot.slane %v250_v30, 1 }
  0xa9   : > { %vm233_vm10 = vcmp.ne.s32.totalorder %v232_v26, 0  ;;  %vm237_vm14 = vcmp.ne.s32.totalorder %v236_v29, 0  ;;  %v255_v35 = vadd.f32 %v253_v33, %v251_v32 }
  0xaa   : > { %vm234_vm13 = vmand %vm230_vm9, %vm233_vm10  ;;  %vm190_vm10 = vcmp.ne.f32.partialorder %v479_v4, %v479_v4  ;;  %v166_v49 = vpop.permute.xlu0 %165 }
  0xab   : > { %vm238_vm0 = vmand %vm234_vm13, %vm237_vm14  ;;  %v272_v36 = vrot.slane %v255_v35, %v468_v3  ;;  %vm182_vm13 = vcmp.ne.s32.totalorder %v181_v41, 0  ;;  %v168_v50 = vsub.f32 %v479_v4, %v166_v49 }
  0xac   : > { %vm249_vm3 = vmand %vm248_vm15, %vm238_vm0 }
  0xad   : > { %v257_v31 = vsel %vm249_vm3, 1, %v430_v1  ;;  %vm191_vm11 = vmxor %vm190_vm10, %vm431_vm1  ;;  %vm187_vm3 = vcmp.ne.s32.totalorder %v186_v44, 0  ;;  %v172_v53 = vrot.slane %v168_v50, %v468_v3 }
  0xae   : > { %v261_v34 = vrot.slane %v257_v31, %v468_v3  ;;  %v193_v42 = vsel %vm191_vm11, 1, %v430_v1  ;;  %vm192_vm14 = vmand %vm189_vm12, %vm191_vm11  ;;  %vm321_vm11 = vcmp.eq.s32.totalorder %v464_v2, 0  ;;  %vm323_vm12 = vcmp.eq.s32.totalorder %v464_v2, 1 }
  0xaf   : > { %v197_v43 = vrot.slane %v193_v42, %v468_v3  ;;  %vm183_vm0 = vmand %vm500_vm5, %vm182_vm13  ;;  %v173_v56 = vsub.f32 %v168_v50, %v172_v53 }
  0xb0   : > { %vm262_vm6 = vcmp.eq.s32.totalorder %v261_v34, 1 }
  0xb1   : > { %vm263_vm2 = vmand %vm256_vm4, %vm262_vm6  ;;  %vm198_vm15 = vcmp.eq.s32.totalorder %v197_v43, 1 }
  0xb2   : > { %vm199_vm4 = vmand %vm192_vm14, %vm198_vm15 }
  0xb3   : > { %vm188_vm6 = vmand %vm183_vm0, %vm187_vm3 }
 0x10f   : > { %v267_v37 = vpop.permute.xlu1 %266 }
 0x110   : > { %vm273_vm7 = vcmp.eq.f32.partialorder %v267_v37, %v272_v36 }
 0x111   : > { %vm274_vm9 = vmand %vm263_vm2, %vm273_vm7 }
 0x112   : > { %v275_v39 = vsel %vm274_vm9, 1.0, %v435_v38  ;;  %vm200_vm2 = vmand %vm199_vm4, %vm188_vm6 }
 0x113   : > { %v277_v40 = vsel %vm276_vm8, %v275_v39, 0.0 }
 0x114   : > { %278 = vadd.xlane.f32.xlu1 %v277_v40 }
 0x1a1   : > { %v279_v45 = vpop.xlane.xlu1 %278 }
 0x1a2   : > { %vm280_vm7 = vcmp.gt.f32.partialorder %v279_v45, 0.0 }
 0x1a3   : > { %vm281_vm8 = vmxor %vm280_vm7, %vm431_vm1 }
 0x1a4   : > { %vm282_vm9 = vmand %vm200_vm2, %vm281_vm8 }
 0x1a5   : > { %v290_v47 = vsel %vm282_vm9, 1, %v430_v1 }
 0x1a6   : > { %292 = vperm.xlu0 %420, %v290_v47  }
 0x1aa   : > { %213 = vrot.lane.b32.xlu0 %v210_v48, %s433_s19 }
 0x225   : > { %v293_v51 = vpop.permute.xlu0 %292 }
 0x226   : > { %vm294_vm5 = vcmp.eq.s32.totalorder %v293_v51, 1 }
 0x227   : > { %v297_v57 = vsel %vm294_vm5, %v173_v56, 0.0 }
 0x229   : > { %v214_v54 = vpop.permute.xlu0 %213 }
 0x22a   : > { %v216_v55 = vadd.f32 %v214_v54, %v211_v52 }
 0x22c   : > { %286 = vperm.xlu0 %420, %v216_v55  }
 0x230   : > { %300 = vperm.xlu0 %420, %v297_v57  }
 0x234   : > { %421 = vset.pattern.permute.xlu0 %v436_v58 }
 0x235   : > { %311 = vperm.xlu0 %421, %v297_v57  }
 0x2ab   : > { %v287_v60 = vpop.permute.xlu0 %286 }
 0x2ac   : > { %vm289_vm1 = vcmp.eq.f32.partialorder %v287_v60, %v283_v59 }
 0x2ad   : > { %vm295_vm10 = vmand %vm294_vm5, %vm289_vm1 }
 0x2ae   : > { %v296_v61 = vsel %vm295_vm10, 1.0, %v435_v38 }
 0x2af   : > { %v301_v62 = vpop.permute.xlu0 %300 }
 0x2b0   : > { %v303_v63 = vmul.f32 %v301_v62, %v296_v61 }
 0x2b2   : > { %v304_v0 = vrot.slane %v303_v63, 4 }
 0x2b4   : > { %v305_v1 = vadd.f32 %v304_v0, %v303_v63  ;;  %v312_v3 = vpop.permute.xlu0 %311 }
 0x2b5   : > { %v314_v4 = vmul.f32 %v312_v3, %v296_v61 }
 0x2b6   : > { %v306_v5 = vrot.slane %v305_v1, 2 }
 0x2b7   : > { %v315_v6 = vrot.slane %v314_v4, 4 }
 0x2b8   : > { %v307_v7 = vadd.f32 %v306_v5, %v305_v1 }
 0x2b9   : > { %v316_v8 = vadd.f32 %v315_v6, %v314_v4 }
 0x2ba   : > { %v308_v9 = vrot.slane %v307_v7, 1 }
 0x2bb   : > { %v317_v10 = vrot.slane %v316_v8, 2 }
 0x2bc   : > { %v309_v12 = vadd.f32 %v308_v9, %v307_v7 }
 0x2bd   : > { %v318_v11 = vadd.f32 %v317_v10, %v316_v8 }
 0x2be   : > { %v322_v15 = vsel %vm321_vm11, %v309_v12, 0.0 }
 0x2bf   : > { %v319_v13 = vrot.slane %v318_v11, 1 }
 0x2c1   : > { %v320_v14 = vadd.f32 %v319_v13, %v318_v11 }
 0x2c3   : > { %v324_v16 = vsel %vm323_vm12, %v320_v14, 0.0 }
 0x2c4   : > { %v325_v17 = vadd.f32 %v324_v16, %v322_v15 }
 0x2c6   : > { %326 = vst [vmem:[%s155_s23] sm:$0xff] %v325_v17 }
 0x2c7 PF: > { %s12_s9 = sadd.s32 1, %s428_s9  }
 0x2c8   : > { %p9_p4 = scmp.ge.s32.totalorder %s12_s9, 6  }
 0x2ca   :  { %11 = sbr.rel (!%p9_p4) target bundleno = 1 (0x1), region = 61 }

</bundles_post_ra>
